<compile_context>
chip_gen: v5e
topology: v5e:2x2
jax: 0.10.0
libtpu: 0.0.40
codegen_flags: <defaults>
</compile_context>

<pallas_src>
import jax
import jax.numpy as jnp
from jax import lax
from jax.experimental import pallas as pl
from jax.experimental.pallas import tpu as pltpu

LANES = 128


def _make_kernel(eps, tile, rows, num_blocks, has_partial):
    """Build the Charbonnier partial-sum kernel.

    All closure values are Python scalars (no traced constants are captured).
    """
    eps = float(eps)

    def _accumulate(acc_ref, charb):
        # (tile, 128) -> (tile//8, 8, 128) is on the (8, 128) sublane-tile
        # boundary, so it is layout-free; the axis-0 sum is pure in-vreg adds.
        acc_ref[...] += charb.reshape(tile // 8, 8, LANES).sum(axis=0)

    def kernel(x_ref, y_ref, out_ref, acc_ref):
        j = pl.program_id(0)

        @pl.when(j == 0)
        def _init():
            acc_ref[...] = jnp.zeros_like(acc_ref)

        # Cast to f32 inside the kernel (VPU); keeps HBM traffic at native
        # dtype width for bf16/fp8 inputs.
        xb = x_ref[...].astype(jnp.float32)
        yb = y_ref[...].astype(jnp.float32)
        diff = xb - yb
        charb = jnp.sqrt(diff * diff + eps)  # eps is a Python float literal

        if has_partial:
            last = num_blocks - 1

            @pl.when(j != last)
            def _full_block():
                _accumulate(acc_ref, charb)

            @pl.when(j == last)
            def _partial_block():
                # Mask the padded rows of the trailing partial block only.
                # Row-index comparison (not a flattened element index), so no
                # int32 overflow for any realistic input size.
                row_ids = j * tile + lax.broadcasted_iota(
                    jnp.int32, (tile, LANES), 0
                )
                masked = jnp.where(row_ids < rows, charb, 0.0)
                _accumulate(acc_ref, masked)
        else:
            _accumulate(acc_ref, charb)

        @pl.when(j == num_blocks - 1)
        def _finalize():
            # Single cross-lane reduce of one vreg at the very end.
            out_ref[0, 0] = jnp.sum(acc_ref[...])

    return kernel


def charbonnier_loss(x, y, eps=1e-9, tile_rows=4096):
    """mean(sqrt((x - y)^2 + eps)), matching the PyTorch CharbonnierLoss."""
    assert x.shape == y.shape, (x.shape, y.shape)
    eps = float(eps)
    n = x.size

    xf = x.reshape(-1)  # zero-copy flatten
    yf = y.reshape(-1)

    itemsize = jnp.dtype(x.dtype).itemsize
    # Native sublane packing: 8 rows (f32), 16 (bf16/f16), 32 (int8/fp8).
    sub = max(8, 32 // max(int(itemsize), 1))

    rows = n // LANES
    tail = n - rows * LANES

    if rows < sub:
        # Too small for a kernel launch to be worthwhile; pure jnp fallback.
        d = xf.astype(jnp.float32) - yf.astype(jnp.float32)
        return jnp.mean(jnp.sqrt(d * d + eps))

    n_main = rows * LANES
    # Zero-copy (rows, 128) slab when n is 128-aligned; otherwise only the
    # aligned prefix is streamed and the <128-element tail is handled below.
    x2d = (xf if tail == 0 else xf[:n_main]).reshape(rows, LANES)
    y2d = (yf if tail == 0 else yf[:n_main]).reshape(rows, LANES)

    # Large streaming tiles, rounded to the dtype's sublane packing.
    tile_rows = max(sub, (int(tile_rows) // sub) * sub)
    tile = min(tile_rows, (rows // sub) * sub)  # tile <= rows, tile % sub == 0
    num_blocks = (rows + tile - 1) // tile
    has_partial = (num_blocks * tile) != rows  # at most one partial block

    kernel = _make_kernel(eps, tile, rows, num_blocks, has_partial)

    cost = pl.CostEstimate(
        flops=5 * n,
        transcendentals=n,
        bytes_accessed=2 * n * int(itemsize) + 4,
    )

    partial = pl.pallas_call(
        kernel,
        out_shape=jax.ShapeDtypeStruct((1, 1), jnp.float32),
        grid_spec=pltpu.PrefetchScalarGridSpec(
            num_scalar_prefetch=0,
            grid=(num_blocks,),
            in_specs=[
                pl.BlockSpec((tile, LANES), lambda j: (j, 0)),
                pl.BlockSpec((tile, LANES), lambda j: (j, 0)),
            ],
            out_specs=pl.BlockSpec(
                (1, 1), lambda j: (0, 0), memory_space=pltpu.MemorySpace.SMEM
            ),
            scratch_shapes=[pltpu.VMEM((8, LANES), jnp.float32)],
        ),
        compiler_params=pltpu.CompilerParams(
            dimension_semantics=("arbitrary",),
        ),
        cost_estimate=cost,
    )(x2d, y2d)

    total = partial[0, 0]
    if tail:
        # Fold the <128-element lane tail in with a tiny jnp expression
        # (keeps the kernel path zero-copy; no jnp.pad re-materialization).
        xt = xf[n_main:].astype(jnp.float32)
        yt = yf[n_main:].astype(jnp.float32)
        dt = xt - yt
        total = total + jnp.sum(jnp.sqrt(dt * dt + eps))

    return total / n


if __name__ == "__main__":
    key = jax.random.PRNGKey(0)
    kx, ky = jax.random.split(key)

    # NCHW inputs, consistent with typical usage of the PyTorch module.
    x = jax.random.normal(kx, (2, 4, 16, 16), dtype=jnp.float32)
    y = jax.random.normal(ky, (2, 4, 16, 16), dtype=jnp.float32)

    loss = charbonnier_loss(x, y, eps=1e-9)
    jax.block_until_ready(loss)

    ref = jnp.mean(jnp.sqrt((x - y) * (x - y) + 1e-9))
    assert jnp.allclose(loss, ref, rtol=1e-5, atol=1e-6), (loss, ref)

    # Ragged case: exercises the partial trailing block mask and the lane tail.
    xr = jax.random.normal(kx, (3, 5, 133), dtype=jnp.float32)  # 1995 elements
    yr = jax.random.normal(ky, (3, 5, 133), dtype=jnp.float32)
    loss_r = charbonnier_loss(xr, yr, eps=1e-9)
    jax.block_until_ready(loss_r)
    ref_r = jnp.mean(jnp.sqrt((xr - yr) * (xr - yr) + 1e-9))
    assert jnp.allclose(loss_r, ref_r, rtol=1e-5, atol=1e-6), (loss_r, ref_r)

    print("KERNEL_OK")
</pallas_src>

<mosaic_0001>
module attributes {stable_mosaic.version = 11 : i64} {
  func.func @kernel(%arg0: i32, %arg1: memref<16x128xf32, #tpu.memory_space<vmem>>, %arg2: memref<16x128xf32, #tpu.memory_space<vmem>>, %arg3: memref<1x1xf32, #tpu.memory_space<smem>>, %arg4: memref<8x128xf32, #tpu.memory_space<vmem>>) attributes {dimension_semantics = [#tpu.dimension_semantics<arbitrary>], iteration_bounds = array<i64: 1>, scalar_prefetch = 0 : i64, scratch_operands = 1 : i64, tpu.core_type = #tpu.core_type<tc>, window_params = [{transform_indices = @transform_0, window_bounds = array<i64: 16, 128>}, {transform_indices = @transform_1, window_bounds = array<i64: 16, 128>}, {transform_indices = @transform_2, window_bounds = array<i64: 1, 1>}]} {
    %c0_i32 = arith.constant 0 : i32
    %0 = arith.cmpi eq, %arg0, %c0_i32 : i32
    %1 = arith.extui %0 : i1 to i32
    %c0_i32_0 = arith.constant 0 : i32
    %2 = arith.cmpi ne, %1, %c0_i32_0 : i32
    scf.if %2 {
      %cst_11 = arith.constant 0.000000e+00 : f32
      %18 = vector.broadcast %cst_11 : f32 to vector<8x128xf32>
      %c0_12 = arith.constant 0 : index
      %c0_13 = arith.constant 0 : index
      %19 = vector.load %arg4[%c0_12, %c0_13] : memref<8x128xf32, #tpu.memory_space<vmem>>, vector<8x128xf32>
      tpu.vector_store %arg4[%c0_12, %c0_13], %18 {strides = array<i32>} : memref<8x128xf32, #tpu.memory_space<vmem>>, vector<8x128xf32>,
    } else {
    }
    %c0 = arith.constant 0 : index
    %c0_1 = arith.constant 0 : index
    %3 = vector.load %arg1[%c0, %c0_1] : memref<16x128xf32, #tpu.memory_space<vmem>>, vector<16x128xf32>
    %c0_2 = arith.constant 0 : index
    %c0_3 = arith.constant 0 : index
    %4 = vector.load %arg2[%c0_2, %c0_3] : memref<16x128xf32, #tpu.memory_space<vmem>>, vector<16x128xf32>
    %5 = arith.subf %3, %4 : vector<16x128xf32>
    %6 = arith.mulf %5, %5 : vector<16x128xf32>
    %cst = arith.constant 9.99999971E-10 : f32
    %7 = vector.broadcast %cst : f32 to vector<16x128xf32>
    %8 = arith.addf %6, %7 : vector<16x128xf32>
    %9 = math.sqrt %8 : vector<16x128xf32>
    %c0_4 = arith.constant 0 : index
    %c0_5 = arith.constant 0 : index
    %10 = vector.load %arg4[%c0_4, %c0_5] : memref<8x128xf32, #tpu.memory_space<vmem>>, vector<8x128xf32>
    %11 = vector.shape_cast %9 : vector<16x128xf32> to vector<2x8x128xf32>
    %cst_6 = arith.constant dense<0.000000e+00> : vector<8x128xf32>
    %12 = vector.multi_reduction <add>, %11, %cst_6 [0] : vector<2x8x128xf32> to vector<8x128xf32>
    %13 = arith.addf %10, %12 : vector<8x128xf32>
    %c0_7 = arith.constant 0 : index
    %c0_8 = arith.constant 0 : index
    %14 = vector.load %arg4[%c0_7, %c0_8] : memref<8x128xf32, #tpu.memory_space<vmem>>, vector<8x128xf32>
    tpu.vector_store %arg4[%c0_7, %c0_8], %13 {strides = array<i32>} : memref<8x128xf32, #tpu.memory_space<vmem>>, vector<8x128xf32>,
    %c0_i32_9 = arith.constant 0 : i32
    %15 = arith.cmpi eq, %arg0, %c0_i32_9 : i32
    %16 = arith.extui %15 : i1 to i32
    %c0_i32_10 = arith.constant 0 : i32
    %17 = arith.cmpi ne, %16, %c0_i32_10 : i32
    scf.if %17 {
      %c0_11 = arith.constant 0 : index
      %c0_12 = arith.constant 0 : index
      %18 = vector.load %arg4[%c0_11, %c0_12] : memref<8x128xf32, #tpu.memory_space<vmem>>, vector<8x128xf32>
      %19 = vector.shape_cast %18 : vector<8x128xf32> to vector<1x8x128xf32>
      %cst_13 = arith.constant dense<0.000000e+00> : vector<1xf32>
      %20 = vector.multi_reduction <add>, %19, %cst_13 [1, 2] : vector<1x8x128xf32> to vector<1xf32>
      %21 = vector.shape_cast %20 : vector<1xf32> to vector<1x1x1xf32>
      %22 = vector.extract %21[0, 0, 0] : f32 from vector<1x1x1xf32>
      %c0_14 = arith.constant 0 : index
      %c0_15 = arith.constant 0 : index
      %23 = memref.load %arg3[%c0_14, %c0_15] : memref<1x1xf32, #tpu.memory_space<smem>>
      memref.store %22, %arg3[%c0_14, %c0_15] : memref<1x1xf32, #tpu.memory_space<smem>>
    } else {
    }
    return
  }
  func.func @transform_0(%arg0: i32) -> (i32, i32) {
    %c0_i32 = arith.constant 0 : i32
    %c0_i32_0 = arith.constant 0 : i32
    return %arg0, %c0_i32 : i32, i32
  }
  func.func @transform_1(%arg0: i32) -> (i32, i32) {
    %c0_i32 = arith.constant 0 : i32
    %c0_i32_0 = arith.constant 0 : i32
    return %arg0, %c0_i32 : i32, i32
  }
  func.func @transform_2(%arg0: i32) -> (i32, i32) {
    %c0_i32 = arith.constant 0 : i32
    %c0_i32_0 = arith.constant 0 : i32
    %c0_i32_1 = arith.constant 0 : i32
    return %c0_i32, %c0_i32_0 : i32, i32
  }
}

</mosaic_0001>

<bundles_post_ra>
// kernel: tpu_custom_call.1
= control target key start
LH: loop header
LB: loop body
LE: loop exit
PB: predicated region body
PF: predicated region fallthrough
CT: control target
= control target key end

     0   :  { %7 = vsyncpa [#allocation4], 0  ;;  %s225_s0 = inlined_call_operand.hbm [shape: f32[16,128], index: 0, kind: input, shape index: {}]   ;;  %s226_s1 = inlined_call_operand.hbm [shape: f32[16,128], index: 1, kind: input, shape index: {}]   ;;  %s227_s2 = inlined_call_operand.hbm [shape: f32[1,1], index: 2, kind: output, shape index: {}]  }
   0x1   :  { %8 = vsyncpa [#allocation7], 0 }
   0x2   :  { %9 = vsyncpa [#allocation5], 0  ;;  %s14_s11 = sshll.u32 %s225_s0, 4  ;;  %s196_s12 = smov [#allocation3]   ;;  %s15_s11 = int_to_ptr.hbm [resolvable:$true] %s14_s11 }
   0x3   :  { %s16_s13 = sshll.u32 %s196_s12, 4  ;;  %s27_s16 = sshll.u32 %s226_s1, 4  ;;  %s17_s13 = int_to_ptr.vmem [resolvable:$true] %s16_s13  ;;  %s28_s16 = int_to_ptr.hbm [resolvable:$true] %s27_s16 }
   0x4   :  { %s197_s17 = smov 128   ;;  %s198_s18 = smov 8  }
   0x5   :  { %22 = dma.hbm_to_vmem [thread:$0]  %s15_s11, 256, %s17_s13, [#allocation4], %s197_s17, %s197_s17, %s198_s18  }
   0x6   :  { %s199_s19 = smov [#allocation6]  }
   0x7   :  { %s29_s20 = sshll.u32 %s199_s19, 4  ;;  %s30_s20 = int_to_ptr.vmem [resolvable:$true] %s29_s20 }
   0x8   :  { %35 = dma.hbm_to_vmem [thread:$0]  %s28_s16, 256, %s30_s20, [#allocation7], %s197_s17, %s197_s17, %s198_s18  }
   0x9   :  { %190 = dma.done.wait [#allocation4], 256  }
   0xa   :  { %191 = vsyncadd [#allocation4], 4294967040 }
   0xb   :  { %192 = dma.done.wait [#allocation7], 256  }
   0xc   :  { %193 = vsyncadd [#allocation7], 4294967040  ;;  %v49_v0 = vld [vmem:[#allocation3] sm:$0xff]  ;;  %v50_v1 = vld [vmem:[#allocation3 + $0x8] sm:$0xff]  ;;  %s107_s21 = sshll.u32 %s227_s2, 4  ;;  %s200_s23 = smov [#allocation8]   ;;  %s108_s21 = int_to_ptr.hbm [resolvable:$true] %s107_s21 }
   0xd   :  { %v51_v2 = vld [vmem:[#allocation6] sm:$0xff]  ;;  %v52_v3 = vld [vmem:[#allocation6 + $0x8] sm:$0xff] }
   0xe   :  { %v53_v4 = vsub.f32 %v49_v0, %v51_v2  ;;  %v54_v5 = vsub.f32 %v50_v1, %v52_v3 }
  0x10   :  { %v55_v6 = vmul.f32 %v53_v4, %v53_v4  ;;  %v56_v7 = vmul.f32 %v54_v5, %v54_v5 }
  0x12   :  { %v57_v8 = vadd.f32 1e-09, %v55_v6  ;;  %v58_v9 = vadd.f32 1e-09, %v56_v7 }
  0x14   :  { %126 = vrsqrt.f32 %v57_v8  ;;  %vm66_vm0 = vcmp.eq.f32.partialorder %v57_v8, inf  ;;  %v69_v21 = vand.u32 2147483648, %v57_v8  ;;  %vm68_vm1 = vcmp.eq.f32.partialorder %v57_v8, 0.0 }
  0x15   :  { %128 = vrsqrt.f32 %v58_v9  ;;  %vm78_vm2 = vcmp.eq.f32.partialorder %v58_v9, inf  ;;  %v81_v24 = vand.u32 2147483648, %v58_v9  ;;  %vm80_vm3 = vcmp.eq.f32.partialorder %v58_v9, 0.0 }
  0x1a   :  { %v127_v10 = vpop.eup %126 }
  0x1b   :  { %v129_v11 = vpop.eup %128  ;;  %v60_v12 = vmul.f32 %v127_v10, %v57_v8 }
  0x1c   :  { %v72_v13 = vmul.f32 %v129_v11, %v58_v9 }
  0x1d   :  { %v61_v14 = vmul.f32 %v127_v10, %v60_v12 }
  0x1e   :  { %v73_v15 = vmul.f32 %v129_v11, %v72_v13 }
  0x1f   :  { %v62_v16 = vmul.f32 0.5, %v61_v14 }
  0x20   :  { %v74_v17 = vmul.f32 0.5, %v73_v15 }
  0x21   :  { %v63_v18 = vsub.f32 1.5, %v62_v16 }
  0x22   :  { %v75_v19 = vsub.f32 1.5, %v74_v17 }
  0x23   :  { %v64_v20 = vmul.f32 %v127_v10, %v63_v18 }
  0x24   :  { %v76_v22 = vmul.f32 %v129_v11, %v75_v19 }
  0x25   :  { %v65_v23 = vmul.f32 %v64_v20, %v57_v8 }
  0x26   :  { %v77_v25 = vmul.f32 %v76_v22, %v58_v9 }
  0x27   :  { %v67_v26 = vsel %vm66_vm0, %v57_v8, %v65_v23 }
  0x28   :  { %v70_v27 = vsel %vm68_vm1, %v69_v21, %v67_v26  ;;  %v79_v28 = vsel %vm78_vm2, %v58_v9, %v77_v25 }
  0x29   :  { %v82_v29 = vsel %vm80_vm3, %v81_v24, %v79_v28 }
  0x2a   :  { %v84_v30 = vadd.f32 %v82_v29, %v70_v27 }
  0x2c   :  { %91 = vadd.xlane.f32.xlu0 %v84_v30 }
  0x9f   :  { %v92_v31 = vpop.xlane.xlu0 %91 }
  0xa0   :  { %v93_v32 = vrot.slane %v92_v31, 4 }
  0xa2   :  { %v94_v33 = vadd.f32 %v93_v32, %v92_v31 }
  0xa4   :  { %v95_v34 = vrot.slane %v94_v33, 2 }
  0xa6   :  { %v96_v35 = vadd.f32 %v95_v34, %v94_v33 }
  0xa8   :  { %v97_v36 = vrot.slane %v96_v35, 1 }
  0xaa   :  { %v98_v37 = vadd.f32 %v97_v36, %v96_v35 }
  0xac   :  { %119 = vpush %v98_v37 }
  0xdd   :  { %s120_s22 = spop %119 }
  0xde   :  { %101 = sst [smem:[#allocation8]] %s120_s22 }
  0xdf   :  { %110 = dma.smem_to_hbm %s200_s23, 16, %s108_s21, [#allocation5]  }
  0xe0   :  { %194 = dma.done.wait [#allocation5], 16  }
  0xe1   :  { %195 = vsyncadd [#allocation5], 4294967280 }
  0xe2   :  { %115 = sfence }
  0xe3   :  { %116 = vsyncpa [#allocation4], 1 }
  0xe4   :  { %117 = vsyncpa [#allocation7], 1 }
  0xe5   :  { %118 = vsyncpa [#allocation5], 1 }

</bundles_post_ra>
